<compile_context>
chip_gen: v7x
topology: tpu7x:2x2x1
jax: 0.10.0
libtpu: 0.0.40
codegen_flags: <defaults>
</compile_context>

<pallas_src>
import functools

import jax
import jax.numpy as jnp
from jax.experimental import pallas as pl
from jax.experimental.pallas import tpu as pltpu


LANE = 128           # TPU lane width / MXU-friendly padding unit
_MIB = 1024 * 1024


def _round_up(x, m):
    return ((x + m - 1) // m) * m


def _choose_tiles(n):
    """Row/col tiles for the (N, N) attention sweep. N_pad is a multiple of both."""
    if n <= 512:
        tm, tn = 128, 128
        n_pad = _round_up(n, 128)
    else:
        tm, tn = 128, 512            # wide col tile: lane-dense adj stream
        n_pad = _round_up(n, 512)
    return tm, tn, n_pad


def _pad2(a, r, c):
    return jnp.pad(a, ((0, r - a.shape[0]), (0, c - a.shape[1])))


# ----------------------------------------------------------------------------
# Kernel 1: wide projection H = sum_g x_g @ W_g (all output heads in one matmul)
#           plus attention logit vectors f1 (column) / f2 (lane-dense row).
# ----------------------------------------------------------------------------
def gat_projection_kernel(x_ref, w_ref, a1_ref, a2_ref,
                          h_out_ref, f1_ref, f2_ref, *,
                          n_groups, n_heads, f_out_pad):
    # One wide bf16 MXU matmul across all output heads; the sum over input groups
    # fuses the inter-layer head-concat (layer 2) without an HBM round trip.
    hcat = jnp.dot(x_ref[0], w_ref[0], preferred_element_type=jnp.float32)
    for g in range(1, n_groups):
        hcat = hcat + jnp.dot(x_ref[g], w_ref[g], preferred_element_type=jnp.float32)

    for h in range(n_heads):
        h16 = hcat[:, h * f_out_pad:(h + 1) * f_out_pad].astype(jnp.bfloat16)
        h_out_ref[h] = h16                                           # (TM, F_out_pad) bf16
        # f1[i] = h_i . a1 (column for the row block), f2[j] = h_j . a2 (row, so the
        # attention kernel never transposes).  Only a (TM,1) -> (1,TM) narrow
        # transpose here -- no full-tile transpose, no (1,F)x(F,TM) matmul.
        f1 = jnp.dot(h16, a1_ref[h], preferred_element_type=jnp.float32)   # (TM, 1)
        f2 = jnp.dot(h16, a2_ref[h], preferred_element_type=jnp.float32)   # (TM, 1)
        f1_ref[h] = f1
        f2_ref[h] = jnp.transpose(f2)                                # (1, TM) lane-dense


def gat_projection(x_groups, w_all, a1_all, a2_all, *, tm):
    n_groups, n_pad, f_in_pad = x_groups.shape
    n_heads, f_out_pad, _ = a1_all.shape
    wide = w_all.shape[2]
    assert wide == n_heads * f_out_pad

    kernel = functools.partial(gat_projection_kernel, n_groups=n_groups,
                               n_heads=n_heads, f_out_pad=f_out_pad)

    vmem = (2 * n_groups * tm * f_in_pad * 2            # x blocks (double-buffered)
            + 2 * n_heads * tm * f_out_pad * 2          # H out blocks
            + 2 * n_heads * tm * LANE * 4               # f1 out blocks (lane padded)
            + 2 * n_heads * 8 * tm * 4                  # f2 out blocks (sublane padded)
            + 2 * n_groups * f_in_pad * wide * 2        # weights
            + 4 * n_heads * f_out_pad * LANE * 2        # a1/a2
            + tm * wide * 4                             # hcat accumulator
            + 8 * _MIB)
    vmem = int(min(48 * _MIB, max(32 * _MIB, vmem)))

    return pl.pallas_call(
        kernel,
        out_shape=(
            jax.ShapeDtypeStruct((n_heads, n_pad, f_out_pad), jnp.bfloat16),
            jax.ShapeDtypeStruct((n_heads, n_pad, 1), jnp.float32),
            jax.ShapeDtypeStruct((n_heads, 1, n_pad), jnp.float32),
        ),
        grid=(n_pad // tm,),
        in_specs=[
            pl.BlockSpec((n_groups, tm, f_in_pad), lambda i: (0, i, 0)),
            pl.BlockSpec((n_groups, f_in_pad, wide), lambda i: (0, 0, 0)),
            pl.BlockSpec((n_heads, f_out_pad, 1), lambda i: (0, 0, 0)),
            pl.BlockSpec((n_heads, f_out_pad, 1), lambda i: (0, 0, 0)),
        ],
        out_specs=(
            pl.BlockSpec((n_heads, tm, f_out_pad), lambda i: (0, i, 0)),
            pl.BlockSpec((n_heads, tm, 1), lambda i: (0, i, 0)),
            pl.BlockSpec((n_heads, 1, tm), lambda i: (0, 0, i)),
        ),
        compiler_params=pltpu.CompilerParams(
            dimension_semantics=("parallel",),
            vmem_limit_bytes=vmem,
        ),
    )(x_groups, w_all, a1_all, a2_all)


# ----------------------------------------------------------------------------
# Kernel 2: tiled masked-attention aggregation, all heads fused, flash-style
#           online softmax, VMEM-resident H, empty adjacency tiles skipped.
# ----------------------------------------------------------------------------
def gat_attention_kernel(counts_ref, adj_ref, h_ref, f1_ref, f2_ref, out_ref,
                         m_sc, l_sc, acc_sc, *,
                         n_heads, tn, alpha, resident, apply_elu, log_softmax_valid):
    i = pl.program_id(0)
    j = pl.program_id(1)
    nj = pl.num_programs(1)

    @pl.when(j == 0)
    def _init():
        m_sc[...] = jnp.full(m_sc.shape, -jnp.inf, dtype=jnp.float32)
        l_sc[...] = jnp.zeros(l_sc.shape, jnp.float32)
        acc_sc[...] = jnp.zeros(acc_sc.shape, jnp.float32)

    # Skip (row-block, col-block) tiles with no edges: on real (sparse) graphs this
    # removes the exp/VALU work and matmuls for the vast majority of tiles.
    # TODO(synk): a compacted per-row-block list of non-empty column tiles would also
    #             avoid DMA-ing the empty adjacency tiles, not just their compute.
    @pl.when(counts_ref[i, j] > 0)
    def _compute():
        adj = adj_ref[...]                                  # int8: 1 edge, 0 no edge, -1 pad col
        # additive mask built ONCE per tile (int8 compare, no f32 cast of the tile)
        mask_add = jnp.where(adj > 0, jnp.float32(0.0),
                             jnp.where(adj < 0, jnp.float32(-1e30), jnp.float32(-1e12)))

        for h in range(n_heads):                            # heads fused: adj tile read once
            f1_col = f1_ref[h]                              # (TM, 1)
            if resident:
                col0 = pl.multiple_of(j * tn, tn)
                f2_row = f2_ref[h, :, pl.ds(col0, tn)]      # (1, TN)
                h_tile = h_ref[h, pl.ds(col0, tn), :]       # (TN, F) bf16, VMEM resident
            else:
                f2_row = f2_ref[h]
                h_tile = h_ref[h]

            # e[r, c] = LeakyReLU(f1[r] + f2[c]); single max for LeakyReLU (alpha < 1)
            e = f1_col + f2_row                             # (TM, TN)
            s = jnp.maximum(e, alpha * e) + mask_add

            # online softmax (running max / sum / accumulator live in VMEM scratch)
            m_prev = m_sc[h]
            m_new = jnp.maximum(m_prev, jnp.max(s, axis=1, keepdims=True))
            corr = jnp.exp(m_prev - m_new)
            p = jnp.exp(s - m_new)                          # (TM, TN) fp32
            l_sc[h] = corr * l_sc[h] + jnp.sum(p, axis=1, keepdims=True)
            acc_sc[h] = corr * acc_sc[h] + jnp.dot(
                p.astype(jnp.bfloat16), h_tile,             # bf16 MXU, fp32 acc
                preferred_element_type=jnp.float32)
            m_sc[h] = m_new

    @pl.when(j == nj - 1)
    def _finalize():
        for h in range(n_heads):
            l = l_sc[h]
            l_safe = jnp.where(l > 0.0, l, jnp.float32(1.0))
            o = acc_sc[h] / l_safe                          # exact divide: runs once per row block
            if apply_elu:
                o = jnp.where(o > 0, o, jnp.exp(jnp.minimum(o, 0.0)) - 1.0)
            if log_softmax_valid is not None:
                # fused final head: mask padded class lanes, then log_softmax(dim=1)
                col = jax.lax.broadcasted_iota(jnp.int32, o.shape, 1)
                o = jnp.where(col < log_softmax_valid, o, jnp.float32(-1e30))
                mx = jnp.max(o, axis=1, keepdims=True)
                z = o - mx
                lse = jnp.log(jnp.sum(jnp.exp(z), axis=1, keepdims=True))
                o = z - lse
            out_ref[h] = o.astype(out_ref.dtype)


def gat_attention(counts, adj_i8, h_all, f1_all, f2_all, *, tm, tn, alpha,
                  apply_elu, out_dtype, log_softmax_valid=None):
    n_heads, n_pad, f_pad = h_all.shape
    ni, nj = n_pad // tm, n_pad // tn

    # Residency plan: keep H (bf16) + f2 resident in VMEM if they fit comfortably
    # inside v7x's 64-MiB physical VMEM (leaves room for pipelined blocks + scratch);
    # otherwise fall back to streaming the column tiles once per row block.
    resident_bytes = n_heads * n_pad * f_pad * 2 + n_heads * 8 * n_pad * 4
    resident = resident_bytes <= 24 * _MIB

    if resident:
        h_spec = pl.BlockSpec((n_heads, n_pad, f_pad), lambda i, j, c: (0, 0, 0))
        f2_spec = pl.BlockSpec((n_heads, 1, n_pad), lambda i, j, c: (0, 0, 0))
        data_bytes = resident_bytes
    else:
        h_spec = pl.BlockSpec((n_heads, tn, f_pad), lambda i, j, c: (0, j, 0))
        f2_spec = pl.BlockSpec((n_heads, 1, tn), lambda i, j, c: (0, 0, j))
        data_bytes = 2 * (n_heads * tn * f_pad * 2 + n_heads * 8 * tn * 4)

    out_itemsize = jnp.dtype(out_dtype).itemsize
    vmem = (data_bytes
            + 2 * tm * tn                               # adj int8 (double-buffered)
            + 2 * n_heads * tm * LANE * 4               # f1 blocks (lane padded)
            + 2 * n_heads * tm * f_pad * out_itemsize   # out block
            + n_heads * tm * (f_pad + 2 * LANE) * 4     # scratch acc / m / l
            + 8 * _MIB)
    vmem = int(min(48 * _MIB, max(32 * _MIB, vmem)))

    kernel = functools.partial(
        gat_attention_kernel, n_heads=n_heads, tn=tn, alpha=alpha,
        resident=resident, apply_elu=apply_elu, log_softmax_valid=log_softmax_valid)

    return pl.pallas_call(
        kernel,
        out_shape=jax.ShapeDtypeStruct((n_heads, n_pad, f_pad), out_dtype),
        grid_spec=pltpu.PrefetchScalarGridSpec(
            num_scalar_prefetch=1,
            grid=(ni, nj),
            in_specs=[
                pl.BlockSpec((tm, tn), lambda i, j, c: (i, j)),              # adj int8
                h_spec,                                                       # H (bf16)
                pl.BlockSpec((n_heads, tm, 1), lambda i, j, c: (0, i, 0)),    # f1 (rows of block)
                f2_spec,                                                      # f2 (cols)
            ],
            out_specs=pl.BlockSpec((n_heads, tm, f_pad), lambda i, j, c: (0, i, 0)),
            scratch_shapes=[
                pltpu.VMEM((n_heads, tm, 1), jnp.float32),       # running max
                pltpu.VMEM((n_heads, tm, 1), jnp.float32),       # running sum
                pltpu.VMEM((n_heads, tm, f_pad), jnp.float32),   # output accumulator
            ]),
        compiler_params=pltpu.CompilerParams(
            dimension_semantics=("parallel", "arbitrary"),
            vmem_limit_bytes=vmem),
    )(counts, adj_i8, h_all, f1_all, f2_all)


# ----------------------------------------------------------------------------
# Full forward (eval mode): dropouts are identity.
# ----------------------------------------------------------------------------
def gat_forward(x, adj, params, *, n_hid, n_class, n_heads, alpha):
    N, n_feat = x.shape
    tm, tn, n_pad = _choose_tiles(N)
    f_in_pad = _round_up(n_feat, LANE)
    f_hid_pad = _round_up(n_hid, LANE)
    c_pad = _round_up(n_class, LANE)

    # node features: bf16, padded, leading "input group" axis of 1
    x_pad = jnp.pad(x.astype(jnp.float32),
                    ((0, n_pad - N), (0, f_in_pad - n_feat))).astype(jnp.bfloat16)[None]

    # adjacency: int8 (1 = edge, 0 = no edge, -1 = padded column -> masked to -1e30)
    adj_e = (adj > 0).astype(jnp.int8)
    adj_i8 = jnp.pad(adj_e, ((0, n_pad - N), (0, 0)))
    adj_i8 = jnp.pad(adj_i8, ((0, 0), (0, n_pad - N)), constant_values=-1)

    # per-tile edge counts -> scalar-prefetched SMEM table; empty tiles skipped in-kernel
    counts = jnp.sum((adj_i8 > 0).astype(jnp.int32)
                     .reshape(n_pad // tm, tm, n_pad // tn, tn), axis=(1, 3))

    # layer-1 params: heads batched into one wide weight (one wide MXU matmul/block)
    w1 = jnp.concatenate([_pad2(W, f_in_pad, f_hid_pad) for (W, _) in params["heads"]],
                         axis=1)[None].astype(jnp.bfloat16)
    a1_1 = jnp.stack([jnp.pad(a[:n_hid], ((0, f_hid_pad - n_hid), (0, 0)))
                      for (_, a) in params["heads"]]).astype(jnp.bfloat16)
    a2_1 = jnp.stack([jnp.pad(a[n_hid:], ((0, f_hid_pad - n_hid), (0, 0)))
                      for (_, a) in params["heads"]]).astype(jnp.bfloat16)

    # hidden multi-head layer (concat=True -> ELU); bf16 activations between layers
    h1, f1_1, f2_1 = gat_projection(x_pad, w1, a1_1, a2_1, tm=tm)
    head_out = gat_attention(counts, adj_i8, h1, f1_1, f2_1, tm=tm, tn=tn, alpha=alpha,
                             apply_elu=True, out_dtype=jnp.bfloat16)
    # head_out: (n_heads, N_pad, f_hid_pad) bf16; columns >= n_hid are exactly zero,
    # so the concat is fused into the next projection as a sum over per-head W slices.

    W_out, a_out = params["out"]
    w2 = jnp.stack([_pad2(W_out[h * n_hid:(h + 1) * n_hid], f_hid_pad, c_pad)
                    for h in range(n_heads)]).astype(jnp.bfloat16)
    a1_2 = jnp.pad(a_out[:n_class], ((0, c_pad - n_class), (0, 0)))[None].astype(jnp.bfloat16)
    a2_2 = jnp.pad(a_out[n_class:], ((0, c_pad - n_class), (0, 0)))[None].astype(jnp.bfloat16)

    # output layer with fused ELU + log_softmax epilogue
    h2, f1_2, f2_2 = gat_projection(head_out, w2, a1_2, a2_2, tm=tm)
    out = gat_attention(counts, adj_i8, h2, f1_2, f2_2, tm=tm, tn=tn, alpha=alpha,
                        apply_elu=True, out_dtype=jnp.float32, log_softmax_valid=n_class)
    # TODO(synk): dropout (input / attention / hidden) is identity (eval mode); rows whose
    #             entire 128-row block has zero edges fall back to zeros instead of the
    #             reference's degenerate uniform-softmax mean (not exercised here).
    return out[0, :N, :n_class]


# ----------------------------------------------------------------------------
# Pure-JAX reference (mirrors the kernel's bf16 quantization points) for checking.
# ----------------------------------------------------------------------------
def _bf16(v):
    return v.astype(jnp.bfloat16).astype(jnp.float32)


def gat_reference(x, adj, params, *, n_hid, n_class, alpha):
    hi = jax.lax.Precision.HIGHEST

    def layer(inp, W, a, f_out, apply_elu):
        h = jnp.dot(_bf16(inp), _bf16(W), precision=hi)
        h16 = _bf16(h)
        f1 = jnp.dot(h16, _bf16(a[:f_out]), precision=hi)     # (N, 1)
        f2 = jnp.dot(h16, _bf16(a[f_out:]), precision=hi)     # (N, 1)
        e = f1 + f2.T
        e = jnp.where(e > 0, e, alpha * e)
        s = jnp.where(adj > 0, e, jnp.float32(-1e12))
        p = jax.nn.softmax(s, axis=1)
        hp = jnp.dot(_bf16(p), h16, precision=hi)
        if apply_elu:
            hp = jnp.where(hp > 0, hp, jnp.exp(jnp.minimum(hp, 0.0)) - 1.0)
        return hp

    heads = [layer(x, W, a, n_hid, True) for (W, a) in params["heads"]]
    h_cat = jnp.concatenate(heads, axis=1)
    W_out, a_out = params["out"]
    out = layer(h_cat, W_out, a_out, n_class, False)
    out = jnp.where(out > 0, out, jnp.exp(jnp.minimum(out, 0.0)) - 1.0)
    return jax.nn.log_softmax(out, axis=1)


# ----------------------------------------------------------------------------
# Deterministic parameter init (xavier_uniform, gain=1.414)
# ----------------------------------------------------------------------------
def xavier_uniform(key, shape, gain=1.414):
    fan_in, fan_out = shape[0], shape[1]
    bound = gain * (6.0 / (fan_in + fan_out)) ** 0.5
    return jax.random.uniform(key, shape, jnp.float32, minval=-bound, maxval=bound)


def init_gat_params(key, n_feat, n_hid, n_class, n_heads):
    keys = jax.random.split(key, 2 * n_heads + 2)
    heads = []
    for i in range(n_heads):
        W = xavier_uniform(keys[2 * i], (n_feat, n_hid))
        a = xavier_uniform(keys[2 * i + 1], (2 * n_hid, 1))
        heads.append((W, a))
    W_out = xavier_uniform(keys[-2], (n_hid * n_heads, n_class))
    a_out = xavier_uniform(keys[-1], (2 * n_class, 1))
    return {"heads": heads, "out": (W_out, a_out)}


# ----------------------------------------------------------------------------
# Main
# ----------------------------------------------------------------------------
if __name__ == "__main__":
    key = jax.random.PRNGKey(0)
    k_x, k_p = jax.random.split(key)

    # shapes consistent with the reference module: N=5 nodes, n_feat=10
    N, n_feat, n_hid, n_class, n_heads = 5, 10, 8, 4, 2
    alpha = 0.2

    x = jax.random.normal(k_x, (N, n_feat), dtype=jnp.float32)
    adj = jnp.array(
        [[0, 1, 0, 1, 1],
         [0, 1, 0, 0, 0],
         [1, 1, 1, 0, 0],
         [0, 1, 0, 1, 1],
         [0, 1, 0, 1, 1]], dtype=jnp.float32)

    params = init_gat_params(k_p, n_feat, n_hid, n_class, n_heads)

    out = gat_forward(x, adj, params, n_hid=n_hid, n_class=n_class,
                      n_heads=n_heads, alpha=alpha)
    jax.block_until_ready(out)

    assert out.shape == (N, n_class)
    assert bool(jnp.all(jnp.isfinite(out)))
    # rows of log_softmax should exp-sum to 1
    assert jnp.allclose(jnp.sum(jnp.exp(out), axis=1), 1.0, atol=1e-3)
    # compare against a pure-JAX reference with matching quantization points
    ref = gat_reference(x, adj, params, n_hid=n_hid, n_class=n_class, alpha=alpha)
    assert jnp.allclose(out, ref, atol=1e-1), float(jnp.max(jnp.abs(out - ref)))

    print("KERNEL_OK")
</pallas_src>

<mosaic_0001>
module attributes {stable_mosaic.version = 11 : i64} {
  func.func @gat_projection_kernel(%arg0: i32, %arg1: memref<1x128x128xbf16, #tpu.memory_space<vmem>>, %arg2: memref<1x128x256xbf16, #tpu.memory_space<vmem>>, %arg3: memref<2x128x1xbf16, #tpu.memory_space<vmem>>, %arg4: memref<2x128x1xbf16, #tpu.memory_space<vmem>>, %arg5: memref<2x128x128xbf16, #tpu.memory_space<vmem>>, %arg6: memref<2x128x1xf32, #tpu.memory_space<vmem>>, %arg7: memref<2x1x128xf32, #tpu.memory_space<vmem>>) attributes {dimension_semantics = [#tpu.dimension_semantics<parallel>], iteration_bounds = array<i64: 1>, scalar_prefetch = 0 : i64, scratch_operands = 0 : i64, tpu.core_type = #tpu.core_type<tc>, window_params = [{transform_indices = @transform_0, window_bounds = array<i64: 1, 128, 128>}, {pipeline_mode = #tpu.pipeline_mode<synchronous>, transform_indices = @transform_1, window_bounds = array<i64: 1, 128, 256>}, {pipeline_mode = #tpu.pipeline_mode<synchronous>, transform_indices = @transform_2, window_bounds = array<i64: 2, 128, 1>}, {pipeline_mode = #tpu.pipeline_mode<synchronous>, transform_indices = @transform_3, window_bounds = array<i64: 2, 128, 1>}, {transform_indices = @transform_4, window_bounds = array<i64: 2, 128, 128>}, {transform_indices = @transform_5, window_bounds = array<i64: 2, 128, 1>}, {transform_indices = @transform_6, window_bounds = array<i64: 2, 1, 128>}]} {
    %c0 = arith.constant 0 : index
    %c0_0 = arith.constant 0 : index
    %c0_1 = arith.constant 0 : index
    %0 = vector.load %arg1[%c0, %c0_0, %c0_1] : memref<1x128x128xbf16, #tpu.memory_space<vmem>>, vector<1x128x128xbf16>
    %1 = vector.shape_cast %0 : vector<1x128x128xbf16> to vector<128x128xbf16>
    %c0_2 = arith.constant 0 : index
    %c0_3 = arith.constant 0 : index
    %c0_4 = arith.constant 0 : index
    %2 = vector.load %arg2[%c0_2, %c0_3, %c0_4] : memref<1x128x256xbf16, #tpu.memory_space<vmem>>, vector<1x128x256xbf16>
    %3 = vector.shape_cast %2 : vector<1x128x256xbf16> to vector<128x256xbf16>
    %cst = arith.constant dense<0.000000e+00> : vector<128x256xf32>
    %4 = tpu.matmul %1, %3, %cst {dimension_numbers = #tpu.dot_dimension_numbers<[1], [0], [0], [1], [0, 0, 1, 1], [], []>} : vector<128x128xbf16>, vector<128x256xbf16>, vector<128x256xf32> -> vector<128x256xf32>
    %5 = vector.extract_strided_slice %4 {offsets = [0, 0], sizes = [128, 128], strides = [1, 1]} : vector<128x256xf32> to vector<128x128xf32>
    %6 = arith.truncf %5 : vector<128x128xf32> to vector<128x128xbf16>
    %c0_5 = arith.constant 0 : index
    %c0_6 = arith.constant 0 : index
    %c0_7 = arith.constant 0 : index
    %7 = vector.load %arg5[%c0_5, %c0_6, %c0_7] : memref<2x128x128xbf16, #tpu.memory_space<vmem>>, vector<1x128x128xbf16>
    %8 = vector.shape_cast %7 : vector<1x128x128xbf16> to vector<128x128xbf16>
    %9 = vector.shape_cast %6 : vector<128x128xbf16> to vector<1x128x128xbf16>
    tpu.vector_store %arg5[%c0_5, %c0_6, %c0_7], %9 {strides = array<i32>} : memref<2x128x128xbf16, #tpu.memory_space<vmem>>, vector<1x128x128xbf16>,
    %c0_8 = arith.constant 0 : index
    %c0_9 = arith.constant 0 : index
    %c0_10 = arith.constant 0 : index
    %10 = vector.load %arg3[%c0_8, %c0_9, %c0_10] : memref<2x128x1xbf16, #tpu.memory_space<vmem>>, vector<1x128x1xbf16>
    %11 = vector.shape_cast %10 : vector<1x128x1xbf16> to vector<128x1xbf16>
    %cst_11 = arith.constant dense<0.000000e+00> : vector<128x1xf32>
    %12 = tpu.matmul %6, %11, %cst_11 {dimension_numbers = #tpu.dot_dimension_numbers<[1], [0], [0], [1], [0, 0, 1, 1], [], []>} : vector<128x128xbf16>, vector<128x1xbf16>, vector<128x1xf32> -> vector<128x1xf32>
    %c0_12 = arith.constant 0 : index
    %c0_13 = arith.constant 0 : index
    %c0_14 = arith.constant 0 : index
    %13 = vector.load %arg4[%c0_12, %c0_13, %c0_14] : memref<2x128x1xbf16, #tpu.memory_space<vmem>>, vector<1x128x1xbf16>
    %14 = vector.shape_cast %13 : vector<1x128x1xbf16> to vector<128x1xbf16>
    %cst_15 = arith.constant dense<0.000000e+00> : vector<128x1xf32>
    %15 = tpu.matmul %6, %14, %cst_15 {dimension_numbers = #tpu.dot_dimension_numbers<[1], [0], [0], [1], [0, 0, 1, 1], [], []>} : vector<128x128xbf16>, vector<128x1xbf16>, vector<128x1xf32> -> vector<128x1xf32>
    %c0_16 = arith.constant 0 : index
    %c0_17 = arith.constant 0 : index
    %c0_18 = arith.constant 0 : index
    %16 = vector.load %arg6[%c0_16, %c0_17, %c0_18] : memref<2x128x1xf32, #tpu.memory_space<vmem>>, vector<1x128x1xf32>
    %17 = vector.shape_cast %16 : vector<1x128x1xf32> to vector<128x1xf32>
    %18 = vector.shape_cast %12 : vector<128x1xf32> to vector<1x128x1xf32>
    tpu.vector_store %arg6[%c0_16, %c0_17, %c0_18], %18 {strides = array<i32>} : memref<2x128x1xf32, #tpu.memory_space<vmem>>, vector<1x128x1xf32>,
    %19 = tpu.transpose %15, [1, 0] : vector<128x1xf32> -> vector<1x128xf32>
    %c0_19 = arith.constant 0 : index
    %c0_20 = arith.constant 0 : index
    %c0_21 = arith.constant 0 : index
    %20 = vector.load %arg7[%c0_19, %c0_20, %c0_21] : memref<2x1x128xf32, #tpu.memory_space<vmem>>, vector<1x1x128xf32>
    %21 = vector.shape_cast %20 : vector<1x1x128xf32> to vector<1x128xf32>
    %22 = vector.shape_cast %19 : vector<1x128xf32> to vector<1x1x128xf32>
    tpu.vector_store %arg7[%c0_19, %c0_20, %c0_21], %22 {strides = array<i32>} : memref<2x1x128xf32, #tpu.memory_space<vmem>>, vector<1x1x128xf32>,
    %23 = vector.extract_strided_slice %4 {offsets = [0, 128], sizes = [128, 128], strides = [1, 1]} : vector<128x256xf32> to vector<128x128xf32>
    %24 = arith.truncf %23 : vector<128x128xf32> to vector<128x128xbf16>
    %c1 = arith.constant 1 : index
    %c0_22 = arith.constant 0 : index
    %c0_23 = arith.constant 0 : index
    %25 = vector.load %arg5[%c1, %c0_22, %c0_23] : memref<2x128x128xbf16, #tpu.memory_space<vmem>>, vector<1x128x128xbf16>
    %26 = vector.shape_cast %25 : vector<1x128x128xbf16> to vector<128x128xbf16>
    %27 = vector.shape_cast %24 : vector<128x128xbf16> to vector<1x128x128xbf16>
    tpu.vector_store %arg5[%c1, %c0_22, %c0_23], %27 {strides = array<i32>} : memref<2x128x128xbf16, #tpu.memory_space<vmem>>, vector<1x128x128xbf16>,
    %c1_24 = arith.constant 1 : index
    %c0_25 = arith.constant 0 : index
    %c0_26 = arith.constant 0 : index
    %28 = vector.load %arg3[%c1_24, %c0_25, %c0_26] : memref<2x128x1xbf16, #tpu.memory_space<vmem>>, vector<1x128x1xbf16>
    %29 = vector.shape_cast %28 : vector<1x128x1xbf16> to vector<128x1xbf16>
    %cst_27 = arith.constant dense<0.000000e+00> : vector<128x1xf32>
    %30 = tpu.matmul %24, %29, %cst_27 {dimension_numbers = #tpu.dot_dimension_numbers<[1], [0], [0], [1], [0, 0, 1, 1], [], []>} : vector<128x128xbf16>, vector<128x1xbf16>, vector<128x1xf32> -> vector<128x1xf32>
    %c1_28 = arith.constant 1 : index
    %c0_29 = arith.constant 0 : index
    %c0_30 = arith.constant 0 : index
    %31 = vector.load %arg4[%c1_28, %c0_29, %c0_30] : memref<2x128x1xbf16, #tpu.memory_space<vmem>>, vector<1x128x1xbf16>
    %32 = vector.shape_cast %31 : vector<1x128x1xbf16> to vector<128x1xbf16>
    %cst_31 = arith.constant dense<0.000000e+00> : vector<128x1xf32>
    %33 = tpu.matmul %24, %32, %cst_31 {dimension_numbers = #tpu.dot_dimension_numbers<[1], [0], [0], [1], [0, 0, 1, 1], [], []>} : vector<128x128xbf16>, vector<128x1xbf16>, vector<128x1xf32> -> vector<128x1xf32>
    %c1_32 = arith.constant 1 : index
    %c0_33 = arith.constant 0 : index
    %c0_34 = arith.constant 0 : index
    %34 = vector.load %arg6[%c1_32, %c0_33, %c0_34] : memref<2x128x1xf32, #tpu.memory_space<vmem>>, vector<1x128x1xf32>
    %35 = vector.shape_cast %34 : vector<1x128x1xf32> to vector<128x1xf32>
    %36 = vector.shape_cast %30 : vector<128x1xf32> to vector<1x128x1xf32>
    tpu.vector_store %arg6[%c1_32, %c0_33, %c0_34], %36 {strides = array<i32>} : memref<2x128x1xf32, #tpu.memory_space<vmem>>, vector<1x128x1xf32>,
    %37 = tpu.transpose %33, [1, 0] : vector<128x1xf32> -> vector<1x128xf32>
    %c1_35 = arith.constant 1 : index
    %c0_36 = arith.constant 0 : index
    %c0_37 = arith.constant 0 : index
    %38 = vector.load %arg7[%c1_35, %c0_36, %c0_37] : memref<2x1x128xf32, #tpu.memory_space<vmem>>, vector<1x1x128xf32>
    %39 = vector.shape_cast %38 : vector<1x1x128xf32> to vector<1x128xf32>
    %40 = vector.shape_cast %37 : vector<1x128xf32> to vector<1x1x128xf32>
    tpu.vector_store %arg7[%c1_35, %c0_36, %c0_37], %40 {strides = array<i32>} : memref<2x1x128xf32, #tpu.memory_space<vmem>>, vector<1x1x128xf32>,
    return
  }
  func.func @transform_0(%arg0: i32) -> (i32, i32, i32) {
    %c0_i32 = arith.constant 0 : i32
    %c0_i32_0 = arith.constant 0 : i32
    %c0_i32_1 = arith.constant 0 : i32
    return %c0_i32, %arg0, %c0_i32_0 : i32, i32, i32
  }
  func.func @transform_1(%arg0: i32) -> (i32, i32, i32) {
    %c0_i32 = arith.constant 0 : i32
    %c0_i32_0 = arith.constant 0 : i32
    %c0_i32_1 = arith.constant 0 : i32
    %c0_i32_2 = arith.constant 0 : i32
    return %c0_i32, %c0_i32_0, %c0_i32_1 : i32, i32, i32
  }
  func.func @transform_2(%arg0: i32) -> (i32, i32, i32) {
    %c0_i32 = arith.constant 0 : i32
    %c0_i32_0 = arith.constant 0 : i32
    %c0_i32_1 = arith.constant 0 : i32
    %c0_i32_2 = arith.constant 0 : i32
    return %c0_i32, %c0_i32_0, %c0_i32_1 : i32, i32, i32
  }
  func.func @transform_3(%arg0: i32) -> (i32, i32, i32) {
    %c0_i32 = arith.constant 0 : i32
    %c0_i32_0 = arith.constant 0 : i32
    %c0_i32_1 = arith.constant 0 : i32
    %c0_i32_2 = arith.constant 0 : i32
    return %c0_i32, %c0_i32_0, %c0_i32_1 : i32, i32, i32
  }
  func.func @transform_4(%arg0: i32) -> (i32, i32, i32) {
    %c0_i32 = arith.constant 0 : i32
    %c0_i32_0 = arith.constant 0 : i32
    %c0_i32_1 = arith.constant 0 : i32
    return %c0_i32, %arg0, %c0_i32_0 : i32, i32, i32
  }
  func.func @transform_5(%arg0: i32) -> (i32, i32, i32) {
    %c0_i32 = arith.constant 0 : i32
    %c0_i32_0 = arith.constant 0 : i32
    %c0_i32_1 = arith.constant 0 : i32
    return %c0_i32, %arg0, %c0_i32_0 : i32, i32, i32
  }
  func.func @transform_6(%arg0: i32) -> (i32, i32, i32) {
    %c0_i32 = arith.constant 0 : i32
    %c0_i32_0 = arith.constant 0 : i32
    %c0_i32_1 = arith.constant 0 : i32
    return %c0_i32, %c0_i32_0, %arg0 : i32, i32, i32
  }
}

</mosaic_0001>

<bundles_post_ra>
// kernel: tpu_custom_call.1
= control target key start
LH: loop header
LB: loop body
LE: loop exit
PB: predicated region body
PF: predicated region fallthrough
CT: control target
= control target key end

     0   :  { %12 = vsyncpa [#allocation3], 0  ;;  %v1813_v2 = vmov 0   ;;  %s2228_s0 = inlined_call_operand.vmem [shape: bf16[1,128,128], index: 0, kind: input, shape index: {}]   ;;  %s2229_s1 = inlined_call_operand.vmem [shape: bf16[1,128,256], index: 1, kind: input, shape index: {}]   ;;  %s2230_s2 = inlined_call_operand.vmem [shape: bf16[2,128,1], index: 2, kind: input, shape index: {}]   ;;  %s2231_s3 = inlined_call_operand.vmem [shape: bf16[2,128,1], index: 3, kind: input, shape index: {}]   ;;  %s2232_s4 = inlined_call_operand.hbm [shape: bf16[2,128,128], index: 4, kind: output, shape index: {0}]   ;;  %s2233_s5 = inlined_call_operand.vmem [shape: f32[2,128,1], index: 5, kind: output, shape index: {1}]   ;;  %s2234_s6 = inlined_call_operand.hbm [shape: f32[2,1,128], index: 6, kind: output, shape index: {2}]  }
   0x1   :  { %v1701_v0 = vld [vmem:[%s2229_s1 + $0x4] ss:$8 sps:$4 sm:$0xff]   ;;  %v1703_v1 = vld [vmem:[%s2229_s1] ss:$8 sps:$4 sm:$0xff]   ;;  %215 = vmatprep.mubr.bf16.mxu0 %v1813_v2  ;;  %v1704_v3 = vld [vmem:[%s2229_s1 + $0x14] ss:$8 sps:$4 sm:$0xff]  }
   0x2   :  { %183 = vmatprep.subr.bf16.mxu0 %v1701_v0  ;;  %v1706_v4 = vld [vmem:[%s2229_s1 + $0x10] ss:$8 sps:$4 sm:$0xff]   ;;  %v1707_v5 = vld [vmem:[%s2229_s1 + $0x24] ss:$8 sps:$4 sm:$0xff]   ;;  %v1709_v6 = vld [vmem:[%s2229_s1 + $0x20] ss:$8 sps:$4 sm:$0xff]  }
   0x3   :  { %184 = vmatpush1.bf16.msra.mxu0 %v1703_v1  ;;  %v1710_v7 = vld [vmem:[%s2229_s1 + $0x34] ss:$8 sps:$4 sm:$0xff]   ;;  %v1712_v8 = vld [vmem:[%s2229_s1 + $0x30] ss:$8 sps:$4 sm:$0xff]   ;;  %v1713_v9 = vld [vmem:[%s2229_s1 + $0x44] ss:$8 sps:$4 sm:$0xff]  }
   0x4   :  { %185 = vmatprep.subr.bf16.mxu0 %v1704_v3  ;;  %v1715_v10 = vld [vmem:[%s2229_s1 + $0x40] ss:$8 sps:$4 sm:$0xff]   ;;  %v1716_v11 = vld [vmem:[%s2229_s1 + $0x54] ss:$8 sps:$4 sm:$0xff]   ;;  %v1718_v12 = vld [vmem:[%s2229_s1 + $0x50] ss:$8 sps:$4 sm:$0xff]  }
   0x5   :  { %v1733_v13 = vld [vmem:[%s2230_s2] sm:$0xff]   ;;  %v1735_v15 = vld [vmem:[%s2230_s2 + $0x8] sm:$0xff]   ;;  %v1737_v17 = vld [vmem:[%s2230_s2 + $0x10] sm:$0xff]  }
   0x6   :  { %v1719_v14 = vld [vmem:[%s2229_s1 + $0x64] ss:$8 sps:$4 sm:$0xff]   ;;  %1566 = vmatprep.subr.bf16.mxu1 %v1733_v13  ;;  %v1721_v16 = vld [vmem:[%s2229_s1 + $0x60] ss:$8 sps:$4 sm:$0xff]   ;;  %v1722_v18 = vld [vmem:[%s2229_s1 + $0x74] ss:$8 sps:$4 sm:$0xff]  }
   0x7   :  { %186 = vmatpush1.bf16.msra.mxu0 %v1706_v4  ;;  %1567 = vmatpush3.bf16.msra.mxu1 %v1733_v13  ;;  %v1724_v19 = vld [vmem:[%s2229_s1 + $0x70] ss:$8 sps:$4 sm:$0xff]   ;;  %v1725_v21 = vld [vmem:[%s2228_s0] sm:$0xff]   ;;  %v1736_v23 = vld [vmem:[%s2230_s2 + $0x48] sm:$0xff]  }
   0x8   :  { %187 = vmatprep.subr.bf16.mxu0 %v1707_v5  ;;  %1568 = vmatprep.subr.bf16.mxu1 %v1735_v15  ;;  %v1739_v20 = vld [vmem:[%s2230_s2 + $0x18] sm:$0xff]   ;;  %v1734_v22 = vld [vmem:[%s2230_s2 + $0x40] sm:$0xff]   ;;  %v1738_v25 = vld [vmem:[%s2230_s2 + $0x50] sm:$0xff]  }
   0x9   :  { %v1741_v24 = vld [vmem:[%s2230_s2 + $0x20] sm:$0xff]   ;;  %v1726_v26 = vld [vmem:[%s2228_s0 + $0x8] sm:$0xff]   ;;  %v1740_v27 = vld [vmem:[%s2230_s2 + $0x58] sm:$0xff]  }
   0xb   :  { %188 = vmatpush1.bf16.msra.mxu0 %v1709_v6  ;;  %1569 = vmatpush3.bf16.msra.mxu1 %v1735_v15 }
   0xc   :  { %189 = vmatprep.subr.bf16.mxu0 %v1710_v7  ;;  %1570 = vmatprep.subr.bf16.mxu1 %v1737_v17 }
   0xf   :  { %190 = vmatpush1.bf16.msra.mxu0 %v1712_v8  ;;  %1571 = vmatpush3.bf16.msra.mxu1 %v1737_v17 }
  0x10   :  { %191 = vmatprep.subr.bf16.mxu0 %v1713_v9  ;;  %1572 = vmatprep.subr.bf16.mxu1 %v1739_v20 }
  0x13   :  { %192 = vmatpush1.bf16.msra.mxu0 %v1715_v10  ;;  %1573 = vmatpush3.bf16.msra.mxu1 %v1739_v20 }
  0x14   :  { %193 = vmatprep.subr.bf16.mxu0 %v1716_v11  ;;  %1574 = vmatprep.subr.bf16.mxu1 %v1741_v24 }
  0x17   :  { %194 = vmatpush1.bf16.msra.mxu0 %v1718_v12  ;;  %1575 = vmatpush3.bf16.msra.mxu1 %v1741_v24 }
  0x18   :  { %195 = vmatprep.subr.bf16.mxu0 %v1719_v14 }
  0x1b   :  { %196 = vmatpush1.bf16.msra.mxu0 %v1721_v16 }
  0x1c   :  { %197 = vmatprep.subr.bf16.mxu0 %v1722_v18 }
  0x1f   :  { %198 = vmatpush1.bf16.msra.mxu0 %v1724_v19 }
  0x20   :  { %1630 = vmatprep.subr.bf16.mxu0 %v1734_v22 }
  0x22   :  { %216 = vmatmul.mubr.bf16.vlgmr.msra.gmra.mrb[0].mxu0 %v1725_v21 }
  0x23   :  { %225 = vmatprep.mubr.bf16.mxu0 %v1813_v2  ;;  %1631 = vmatpush3.bf16.msra.mxu0 %v1734_v22 }
  0x24   :  { %1632 = vmatprep.subr.bf16.mxu0 %v1736_v23 }
  0x27   :  { %1633 = vmatpush3.bf16.msra.mxu0 %v1736_v23 }
  0x28   :  { %1634 = vmatprep.subr.bf16.mxu0 %v1738_v25 }
  0x2a   :  { %226 = vmatmul.mubr.bf16.gmra.mrb[4].mxu0 %v1726_v26 }
  0x2b   :  { %235 = vmatprep.mubr.bf16.mxu0 %v1813_v2  ;;  %1635 = vmatpush3.bf16.msra.mxu0 %v1738_v25 }
  0x2c   :  { %13 = vsyncpa [#allocation5], 0  ;;  %1636 = vmatprep.subr.bf16.mxu0 %v1740_v27  ;;  %v1742_v28 = vld [vmem:[%s2230_s2 + $0x60] sm:$0xff]   ;;  %v1727_v29 = vld [vmem:[%s2228_s0 + $0x10] sm:$0xff]   ;;  %vm698_vm0 = vcmask 7168  }
  0x2d   :  { %v1728_v30 = vld [vmem:[%s2228_s0 + $0x18] sm:$0xff]   ;;  %v1729_v31 = vld [vmem:[%s2228_s0 + $0x20] sm:$0xff]   ;;  %v1730_v32 = vld [vmem:[%s2228_s0 + $0x28] sm:$0xff]  }
  0x2e   :  { %v1731_v33 = vld [vmem:[%s2228_s0 + $0x30] sm:$0xff]   ;;  %v1732_v34 = vld [vmem:[%s2228_s0 + $0x38] sm:$0xff]   ;;  %v1743_v35 = vld [vmem:[%s2230_s2 + $0x28] sm:$0xff]  }
  0x2f   :  { %1637 = vmatpush3.bf16.msra.mxu0 %v1740_v27  ;;  %v1744_v36 = vld [vmem:[%s2230_s2 + $0x68] sm:$0xff]   ;;  %1576 = vmatprep.subr.bf16.mxu1 %v1743_v35  ;;  %v1745_v37 = vld [vmem:[%s2230_s2 + $0x30] sm:$0xff]   ;;  %v1747_v39 = vld [vmem:[%s2230_s2 + $0x38] sm:$0xff]  }
  0x30   :  { %1638 = vmatprep.subr.bf16.mxu0 %v1742_v28  ;;  %1577 = vmatpush3.bf16.msra.mxu1 %v1743_v35  ;;  %v1746_v38 = vld [vmem:[%s2230_s2 + $0x70] sm:$0xff]   ;;  %v1748_v40 = vld [vmem:[%s2230_s2 + $0x78] sm:$0xff]   ;;  %v1749_v41 = vld [vmem:[%s2231_s3] sm:$0xff]  }
  0x31   :  { %1578 = vmatprep.subr.bf16.mxu1 %v1745_v37  ;;  %v1750_v53 = vld [vmem:[%s2231_s3 + $0x8] sm:$0xff]   ;;  %v1751_v55 = vld [vmem:[%s2231_s3 + $0x10] sm:$0xff]   ;;  %v1752_v61 = vld [vmem:[%s2231_s3 + $0x18] sm:$0xff]  }
  0x32   :  { %236 = vmatmul.mubr.bf16.gmra.mrb[8].mxu0 %v1727_v29  ;;  %v1753_v63 = vld [vmem:[%s2231_s3 + $0x20] sm:$0xff]   ;;  %v1754_v5 = vld [vmem:[%s2231_s3 + $0x28] sm:$0xff]   ;;  %v1755_v7 = vld [vmem:[%s2231_s3 + $0x30] sm:$0xff]  }
  0x33   :  { %245 = vmatprep.mubr.bf16.mxu0 %v1813_v2  ;;  %1639 = vmatpush3.bf16.msra.mxu0 %v1742_v28  ;;  %v1756_v13 = vld [vmem:[%s2231_s3 + $0x38] sm:$0xff]   ;;  %v1757_v15 = vld [vmem:[%s2231_s3 + $0x40] sm:$0xff]   ;;  %v1759_v35 = vld [vmem:[%s2231_s3 + $0x50] sm:$0xff]  }
  0x34   :  { %1640 = vmatprep.subr.bf16.mxu0 %v1744_v36  ;;  %1579 = vmatpush3.bf16.msra.mxu1 %v1745_v37  ;;  %v1761_v37 = vld [vmem:[%s2231_s3 + $0x60] sm:$0xff]  }
  0x35   :  { %1580 = vmatprep.subr.bf16.mxu1 %v1747_v39 }
  0x37   :  { %1641 = vmatpush3.bf16.msra.mxu0 %v1744_v36  ;;  %v1760_v36 = vld [vmem:[%s2231_s3 + $0x58] sm:$0xff]  }
  0x38   :  { %1642 = vmatprep.subr.bf16.mxu0 %v1746_v38  ;;  %1581 = vmatpush3.bf16.msra.mxu1 %v1747_v39  ;;  %v1763_v39 = vld [vmem:[%s2231_s3 + $0x70] sm:$0xff]  }
  0x39   :  { %1598 = vmatprep.subr.bf16.mxu1 %v1749_v41 }
  0x3a   :  { %246 = vmatmul.mubr.bf16.gmra.mrb[12].mxu0 %v1728_v30 }
  0x3b   :  { %255 = vmatprep.mubr.bf16.mxu0 %v1813_v2  ;;  %1643 = vmatpush3.bf16.msra.mxu0 %v1746_v38  ;;  %v1762_v38 = vld [vmem:[%s2231_s3 + $0x68] sm:$0xff]  }
  0x3c   :  { %1644 = vmatprep.subr.bf16.mxu0 %v1748_v40 }
  0x3f   :  { %1645 = vmatpush3.bf16.msra.mxu0 %v1748_v40  ;;  %v1764_v40 = vld [vmem:[%s2231_s3 + $0x78] sm:$0xff]  }
  0x42   :  { %256 = vmatmul.mubr.bf16.gmra.mrb[16].mxu0 %v1729_v31 }
  0x43   :  { %265 = vmatprep.mubr.bf16.mxu0 %v1813_v2 }
  0x4a   :  { %266 = vmatmul.mubr.bf16.gmra.mrb[20].mxu0 %v1730_v32 }
  0x4b   :  { %275 = vmatprep.mubr.bf16.mxu0 %v1813_v2 }
  0x52   :  { %276 = vmatmul.mubr.bf16.gmra.mrb[24].mxu0 %v1731_v33 }
  0x53   :  { %285 = vmatprep.mubr.bf16.mxu0 %v1813_v2 }
  0x5a   :  { %286 = vmatmul.mubr.bf16.gmra.mrb[28].mxu0 %v1732_v34  ;;  %v1758_v34 = vld [vmem:[%s2231_s3 + $0x48] sm:$0xff]  }
  0xf5   :  { %v217_v42 = vpop.f32.mrb[0].mxu0 }
  0xf6   :  { %v219_v43 = vpop.f32.mrb[1].mxu0 }
  0xf7   :  { %v221_v44 = vpop.f32.mrb[2].mxu0 }
  0xf8   :  { %v1986_v45 = vpack.c.bf16 %v221_v44, %v217_v42  ;;  %v223_v46 = vpop.f32.mrb[3].mxu0 }
  0xf9   :  { %v1988_v47 = vpack.c.bf16 %v223_v46, %v219_v43 }
  0xfa   :  { %1412 = vst [vmem:[#allocation2] sm:$0xff] %v1986_v45   ;;  %1582 = vmatprep.mubr.bf16.mxu1 %v1986_v45 }
  0xfb   :  { %1452 = vst [vmem:[#allocation2 + $0x40] sm:$0xff] %v1988_v47   ;;  %1646 = vmatprep.mubr.bf16.mxu0 %v1988_v47 }
  0xfd   :  { %v227_v48 = vpop.f32.mrb[4].mxu0 }
  0xfe   :  { %v229_v49 = vpop.f32.mrb[5].mxu0 }
  0xff   :  { %v231_v50 = vpop.f32.mrb[6].mxu0 }
 0x100   :  { %v1994_v51 = vpack.c.bf16 %v231_v50, %v227_v48  ;;  %v233_v52 = vpop.f32.mrb[7].mxu0 }
 0x101   :  { %v1999_v54 = vpack.c.bf16 %v233_v52, %v229_v49 }
 0x102   :  { %1488 = vst [vmem:[#allocation2 + $0x8] sm:$0xff] %v1994_v51   ;;  %1583 = vmatmul.mubr.bf16.vlgmr.msra.gmra.mrb[0].mxu1 %v1994_v51 }
 0x103   :  { %1495 = vst [vmem:[#allocation2 + $0x48] sm:$0xff] %v1999_v54   ;;  %1647 = vmatmul.mubr.bf16.vlgmr.msra.gmra.mrb[32].mxu0 %v1999_v54  ;;  %1599 = vmatpush3.bf16.msra.mxu1 %v1749_v41 }
 0x104   :  { %1600 = vmatprep.subr.bf16.mxu1 %v1750_v53 }
 0x105   :  { %v237_v56 = vpop.f32.mrb[8].mxu0 }
 0x106   :  { %v239_v57 = vpop.f32.mrb[9].mxu0 }
 0x107   :  { %v241_v58 = vpop.f32.mrb[10].mxu0  ;;  %1601 = vmatpush3.bf16.msra.mxu1 %v1750_v53 }
 0x108   :  { %v2008_v59 = vpack.c.bf16 %v241_v58, %v237_v56  ;;  %v243_v60 = vpop.f32.mrb[11].mxu0  ;;  %1602 = vmatprep.subr.bf16.mxu1 %v1751_v55 }
 0x109   :  { %v2013_v62 = vpack.c.bf16 %v243_v60, %v239_v57 }
 0x10a   :  { %1489 = vst [vmem:[#allocation2 + $0x10] sm:$0xff] %v2008_v59   ;;  %1586 = vmatprep.mubr.bf16.mxu1 %v2008_v59 }
 0x10b   :  { %1496 = vst [vmem:[#allocation2 + $0x50] sm:$0xff] %v2013_v62   ;;  %1650 = vmatprep.mubr.bf16.mxu0 %v2013_v62  ;;  %1603 = vmatpush3.bf16.msra.mxu1 %v1751_v55 }
 0x10c   :  { %1604 = vmatprep.subr.bf16.mxu1 %v1752_v61 }
 0x10d   :  { %v247_v0 = vpop.f32.mrb[12].mxu0 }
 0x10e   :  { %v249_v1 = vpop.f32.mrb[13].mxu0 }
 0x10f   :  { %v251_v2 = vpop.f32.mrb[14].mxu0  ;;  %1605 = vmatpush3.bf16.msra.mxu1 %v1752_v61 }
 0x110   :  { %v2022_v3 = vpack.c.bf16 %v251_v2, %v247_v0  ;;  %v253_v4 = vpop.f32.mrb[15].mxu0  ;;  %1606 = vmatprep.subr.bf16.mxu1 %v1753_v63 }
 0x111   :  { %v2027_v6 = vpack.c.bf16 %v253_v4, %v249_v1 }
 0x112   :  { %1490 = vst [vmem:[#allocation2 + $0x18] sm:$0xff] %v2022_v3   ;;  %1587 = vmatmul.mubr.bf16.gmra.mrb[4].mxu1 %v2022_v3 }
 0x113   :  { %1497 = vst [vmem:[#allocation2 + $0x58] sm:$0xff] %v2027_v6   ;;  %1651 = vmatmul.mubr.bf16.gmra.mrb[36].mxu0 %v2027_v6  ;;  %1607 = vmatpush3.bf16.msra.mxu1 %v1753_v63 }
 0x114   :  { %1608 = vmatprep.subr.bf16.mxu1 %v1754_v5 }
 0x115   :  { %v257_v8 = vpop.f32.mrb[16].mxu0 }
 0x116   :  { %v259_v9 = vpop.f32.mrb[17].mxu0 }
 0x117   :  { %v261_v10 = vpop.f32.mrb[18].mxu0  ;;  %1609 = vmatpush3.bf16.msra.mxu1 %v1754_v5 }
 0x118   :  { %v300_v11 = vpack.c.bf16 %v261_v10, %v257_v8  ;;  %v263_v12 = vpop.f32.mrb[19].mxu0  ;;  %1610 = vmatprep.subr.bf16.mxu1 %v1755_v7 }
 0x119   :  { %v2039_v14 = vpack.c.bf16 %v263_v12, %v259_v9 }
 0x11a   :  { %1491 = vst [vmem:[#allocation2 + $0x20] sm:$0xff] %v300_v11   ;;  %1590 = vmatprep.mubr.bf16.mxu1 %v300_v11 }
 0x11b   :  { %1498 = vst [vmem:[#allocation2 + $0x60] sm:$0xff] %v2039_v14   ;;  %1654 = vmatprep.mubr.bf16.mxu0 %v2039_v14  ;;  %1611 = vmatpush3.bf16.msra.mxu1 %v1755_v7 }
 0x11c   :  { %1612 = vmatprep.subr.bf16.mxu1 %v1756_v13 }
 0x11d   :  { %v267_v16 = vpop.f32.mrb[20].mxu0 }
 0x11e   :  { %v269_v17 = vpop.f32.mrb[21].mxu0 }
 0x11f   :  { %v271_v18 = vpop.f32.mrb[22].mxu0  ;;  %1613 = vmatpush3.bf16.msra.mxu1 %v1756_v13 }
 0x120   :  { %v301_v19 = vpack.c.bf16 %v271_v18, %v267_v16  ;;  %v273_v20 = vpop.f32.mrb[23].mxu0  ;;  %1662 = vmatprep.subr.bf16.mxu1 %v1757_v15 }
 0x121   :  { %v753_v21 = vpack.c.bf16 %v273_v20, %v269_v17 }
 0x122   :  { %1492 = vst [vmem:[#allocation2 + $0x28] sm:$0xff] %v301_v19   ;;  %1591 = vmatmul.mubr.bf16.gmra.mrb[8].mxu1 %v301_v19 }
 0x123   :  { %1499 = vst [vmem:[#allocation2 + $0x68] sm:$0xff] %v753_v21   ;;  %1655 = vmatmul.mubr.bf16.gmra.mrb[40].mxu0 %v753_v21 }
 0x125   :  { %v277_v22 = vpop.f32.mrb[24].mxu0 }
 0x126   :  { %v279_v23 = vpop.f32.mrb[25].mxu0 }
 0x127   :  { %v281_v24 = vpop.f32.mrb[26].mxu0 }
 0x128   :  { %v302_v25 = vpack.c.bf16 %v281_v24, %v277_v22  ;;  %v283_v26 = vpop.f32.mrb[27].mxu0 }
 0x129   :  { %v754_v27 = vpack.c.bf16 %v283_v26, %v279_v23 }
 0x12a   :  { %1493 = vst [vmem:[#allocation2 + $0x30] sm:$0xff] %v302_v25   ;;  %1594 = vmatprep.mubr.bf16.mxu1 %v302_v25 }
 0x12b   :  { %1500 = vst [vmem:[#allocation2 + $0x70] sm:$0xff] %v754_v27   ;;  %1658 = vmatprep.mubr.bf16.mxu0 %v754_v27 }
 0x12d   :  { %v287_v28 = vpop.f32.mrb[28].mxu0 }
 0x12e   :  { %v289_v29 = vpop.f32.mrb[29].mxu0 }
 0x12f   :  { %v291_v30 = vpop.f32.mrb[30].mxu0 }
 0x130   :  { %v303_v31 = vpack.c.bf16 %v291_v30, %v287_v28  ;;  %v293_v32 = vpop.f32.mrb[31].mxu0 }
 0x131   :  { %v755_v33 = vpack.c.bf16 %v293_v32, %v289_v29 }
 0x132   :  { %1494 = vst [vmem:[#allocation2 + $0x38] sm:$0xff] %v303_v31   ;;  %1595 = vmatmul.mubr.bf16.gmra.mrb[12].mxu1 %v303_v31 }
 0x133   :  { %1501 = vst [vmem:[#allocation2 + $0x78] sm:$0xff] %v755_v33   ;;  %1614 = vmatprep.mubr.bf16.mxu1 %v1986_v45  ;;  %1659 = vmatmul.mubr.bf16.gmra.mrb[44].mxu0 %v755_v33 }
 0x13a   :  { %1615 = vmatmul.mubr.bf16.vlgmr.msra.gmra.mrb[16].mxu1 %v1994_v51 }
 0x13b   :  { %1663 = vmatpush3.bf16.msra.mxu1 %v1757_v15  ;;  %1618 = vmatprep.mubr.bf16.mxu1 %v2008_v59 }
 0x13c   :  { %1664 = vmatprep.subr.bf16.mxu1 %v1758_v34 }
 0x13f   :  { %1665 = vmatpush3.bf16.msra.mxu1 %v1758_v34 }
 0x140   :  { %1666 = vmatprep.subr.bf16.mxu1 %v1759_v35 }
 0x142   :  { %1619 = vmatmul.mubr.bf16.gmra.mrb[20].mxu1 %v2022_v3 }
 0x143   :  { %1667 = vmatpush3.bf16.msra.mxu1 %v1759_v35  ;;  %1622 = vmatprep.mubr.bf16.mxu1 %v300_v11 }
 0x144   :  { %1668 = vmatprep.subr.bf16.mxu1 %v1760_v36 }
 0x147   :  { %1669 = vmatpush3.bf16.msra.mxu1 %v1760_v36 }
 0x148   :  { %1670 = vmatprep.subr.bf16.mxu1 %v1761_v37 }
 0x14a   :  { %1623 = vmatmul.mubr.bf16.gmra.mrb[24].mxu1 %v301_v19 }
 0x14b   :  { %1671 = vmatpush3.bf16.msra.mxu1 %v1761_v37  ;;  %1626 = vmatprep.mubr.bf16.mxu1 %v302_v25 }
 0x14c   :  { %1672 = vmatprep.subr.bf16.mxu1 %v1762_v38 }
 0x14f   :  { %1673 = vmatpush3.bf16.msra.mxu1 %v1762_v38 }
 0x150   :  { %1674 = vmatprep.subr.bf16.mxu1 %v1763_v39 }
 0x152   :  { %1627 = vmatmul.mubr.bf16.gmra.mrb[28].mxu1 %v303_v31 }
 0x153   :  { %1675 = vmatpush3.bf16.msra.mxu1 %v1763_v39  ;;  %1678 = vmatprep.mubr.bf16.mxu1 %v1988_v47 }
 0x154   :  { %1676 = vmatprep.subr.bf16.mxu1 %v1764_v40 }
 0x157   :  { %1677 = vmatpush3.bf16.msra.mxu1 %v1764_v40 }
 0x15a   :  { %1679 = vmatmul.mubr.bf16.vlgmr.msra.gmra.mrb[32].mxu1 %v1999_v54 }
 0x15b   :  { %1682 = vmatprep.mubr.bf16.mxu1 %v2013_v62 }
 0x162   :  { %1683 = vmatmul.mubr.bf16.gmra.mrb[36].mxu1 %v2027_v6 }
 0x163   :  { %1686 = vmatprep.mubr.bf16.mxu1 %v2039_v14 }
 0x16a   :  { %1687 = vmatmul.mubr.bf16.gmra.mrb[40].mxu1 %v753_v21 }
 0x16b   :  { %1690 = vmatprep.mubr.bf16.mxu1 %v754_v27 }
 0x172   :  { %1691 = vmatmul.mubr.bf16.gmra.mrb[44].mxu1 %v755_v33 }
 0x1d5   :  { %v1584_v41 = vpop.f32.mrb[0].mxu1 }
 0x1d6   :  { %701 = vst.msk [vmem:[%s2233_s5 + $0x10] sm:$0xff] %vm698_vm0, %v1584_v41  ;;  %v474_v42 = vpop.f32.mrb[1].mxu1  ;;  %v1648_v43 = vpop.f32.mrb[32].mxu0 }
 0x1d7   :  { %699 = vst.msk [vmem:[%s2233_s5] sm:$0xff] %vm698_vm0, %v474_v42  ;;  %1362 = vst.msk [vmem:[%s2233_s5 + $0x90] sm:$0xff] %vm698_vm0, %v1648_v43  ;;  %v1585_v44 = vpop.f32.mrb[2].mxu1  ;;  %v928_v45 = vpop.f32.mrb[33].mxu0 }
 0x1d8   :  { %702 = vst.msk [vmem:[%s2233_s5 + $0x18] sm:$0xff] %vm698_vm0, %v1585_v44  ;;  %1360 = vst.msk [vmem:[%s2233_s5 + $0x80] sm:$0xff] %vm698_vm0, %v928_v45  ;;  %v477_v46 = vpop.f32.mrb[3].mxu1  ;;  %v1649_v47 = vpop.f32.mrb[34].mxu0 }
 0x1d9   :  { %700 = vst.msk [vmem:[%s2233_s5 + $0x8] sm:$0xff] %vm698_vm0, %v477_v46  ;;  %1363 = vst.msk [vmem:[%s2233_s5 + $0x98] sm:$0xff] %vm698_vm0, %v1649_v47  ;;  %v931_v48 = vpop.f32.mrb[35].mxu0 }
 0x1da   :  { %1361 = vst.msk [vmem:[%s2233_s5 + $0x88] sm:$0xff] %vm698_vm0, %v931_v48 }
 0x1e5   :  { %v1588_v49 = vpop.f32.mrb[4].mxu1 }
 0x1e6   :  { %705 = vst.msk [vmem:[%s2233_s5 + $0x30] sm:$0xff] %vm698_vm0, %v1588_v49  ;;  %v490_v50 = vpop.f32.mrb[5].mxu1  ;;  %v1652_v51 = vpop.f32.mrb[36].mxu0 }
 0x1e7   :  { %703 = vst.msk [vmem:[%s2233_s5 + $0x20] sm:$0xff] %vm698_vm0, %v490_v50  ;;  %1366 = vst.msk [vmem:[%s2233_s5 + $0xb0] sm:$0xff] %vm698_vm0, %v1652_v51  ;;  %v1589_v52 = vpop.f32.mrb[6].mxu1  ;;  %v944_v53 = vpop.f32.mrb[37].mxu0 }
 0x1e8   :  { %706 = vst.msk [vmem:[%s2233_s5 + $0x38] sm:$0xff] %vm698_vm0, %v1589_v52  ;;  %1364 = vst.msk [vmem:[%s2233_s5 + $0xa0] sm:$0xff] %vm698_vm0, %v944_v53  ;;  %v493_v54 = vpop.f32.mrb[7].mxu1  ;;  %v1653_v55 = vpop.f32.mrb[38].mxu0 }
 0x1e9   :  { %704 = vst.msk [vmem:[%s2233_s5 + $0x28] sm:$0xff] %vm698_vm0, %v493_v54  ;;  %1367 = vst.msk [vmem:[%s2233_s5 + $0xb8] sm:$0xff] %vm698_vm0, %v1653_v55  ;;  %v947_v56 = vpop.f32.mrb[39].mxu0 }
 0x1ea   :  { %1365 = vst.msk [vmem:[%s2233_s5 + $0xa8] sm:$0xff] %vm698_vm0, %v947_v56 }
 0x1f5   :  { %v1592_v57 = vpop.f32.mrb[8].mxu1 }
 0x1f6   :  { %709 = vst.msk [vmem:[%s2233_s5 + $0x50] sm:$0xff] %vm698_vm0, %v1592_v57  ;;  %v506_v58 = vpop.f32.mrb[9].mxu1  ;;  %v1656_v59 = vpop.f32.mrb[40].mxu0 }
 0x1f7   :  { %707 = vst.msk [vmem:[%s2233_s5 + $0x40] sm:$0xff] %vm698_vm0, %v506_v58  ;;  %1370 = vst.msk [vmem:[%s2233_s5 + $0xd0] sm:$0xff] %vm698_vm0, %v1656_v59  ;;  %v1593_v60 = vpop.f32.mrb[10].mxu1  ;;  %v960_v61 = vpop.f32.mrb[41].mxu0 }
 0x1f8   :  { %710 = vst.msk [vmem:[%s2233_s5 + $0x58] sm:$0xff] %vm698_vm0, %v1593_v60  ;;  %1368 = vst.msk [vmem:[%s2233_s5 + $0xc0] sm:$0xff] %vm698_vm0, %v960_v61  ;;  %v509_v62 = vpop.f32.mrb[11].mxu1  ;;  %v1657_v63 = vpop.f32.mrb[42].mxu0 }
 0x1f9   :  { %708 = vst.msk [vmem:[%s2233_s5 + $0x48] sm:$0xff] %vm698_vm0, %v509_v62  ;;  %1371 = vst.msk [vmem:[%s2233_s5 + $0xd8] sm:$0xff] %vm698_vm0, %v1657_v63  ;;  %v963_v0 = vpop.f32.mrb[43].mxu0 }
 0x1fa   :  { %1369 = vst.msk [vmem:[%s2233_s5 + $0xc8] sm:$0xff] %vm698_vm0, %v963_v0 }
 0x205   :  { %v1596_v1 = vpop.f32.mrb[12].mxu1 }
 0x206   :  { %713 = vst.msk [vmem:[%s2233_s5 + $0x70] sm:$0xff] %vm698_vm0, %v1596_v1  ;;  %v522_v2 = vpop.f32.mrb[13].mxu1  ;;  %v1660_v3 = vpop.f32.mrb[44].mxu0 }
 0x207   :  { %711 = vst.msk [vmem:[%s2233_s5 + $0x60] sm:$0xff] %vm698_vm0, %v522_v2  ;;  %1374 = vst.msk [vmem:[%s2233_s5 + $0xf0] sm:$0xff] %vm698_vm0, %v1660_v3  ;;  %v1597_v4 = vpop.f32.mrb[14].mxu1  ;;  %v976_v5 = vpop.f32.mrb[45].mxu0 }
 0x208   :  { %714 = vst.msk [vmem:[%s2233_s5 + $0x78] sm:$0xff] %vm698_vm0, %v1597_v4  ;;  %1372 = vst.msk [vmem:[%s2233_s5 + $0xe0] sm:$0xff] %vm698_vm0, %v976_v5  ;;  %v525_v6 = vpop.f32.mrb[15].mxu1  ;;  %v1661_v7 = vpop.f32.mrb[46].mxu0 }
 0x209   :  { %712 = vst.msk [vmem:[%s2233_s5 + $0x68] sm:$0xff] %vm698_vm0, %v525_v6  ;;  %1375 = vst.msk [vmem:[%s2233_s5 + $0xf8] sm:$0xff] %vm698_vm0, %v1661_v7  ;;  %v979_v8 = vpop.f32.mrb[47].mxu0 }
 0x20a   :  { %1373 = vst.msk [vmem:[%s2233_s5 + $0xe8] sm:$0xff] %vm698_vm0, %v979_v8  ;;  %s1814_s5 = smov [#allocation2]  }
 0x20b   :  { %s1209_s13 = sshll.u32 %s1814_s5, 4  ;;  %s1210_s13 = int_to_ptr.vmem [resolvable:$true] %s1209_s13 }
 0x20c   :  { %s1765_s14 = scalar_lea.vmem %s1210_s13, 2048  ;;  %p1770_p1 = scmp.lt.s32.totalorder %s1210_s13, %s1210_s13 }
 0x20d   :  { %v1616_v9 = vpop.f32.mrb[16].mxu1  ;;  %p1766_p0 = scmp.ne.s32.totalorder %s1210_s13, %s1765_s14  ;;  %p1771_p2 = scmp.lt.s32.totalorder %s1765_s14, %s1765_s14 }
 0x20e   :  { %v635_v10 = vpop.f32.mrb[17].mxu1 }
 0x20f   :  { %715 = vxpose.xlu0.b32.start [1/16] (narrow) %v635_v10, 8  ;;  %v1617_v11 = vpop.f32.mrb[18].mxu1  ;;  %p1772_p3 = por %p1771_p2, %p1770_p1 }
 0x210   :  { %v638_v12 = vpop.f32.mrb[19].mxu1 }
 0x211   :  { %p1773_p4 = pnand %p1772_p3, %p1766_p0 }
 0x213   :  { %716 = vxpose.xlu0.b32.cont [2/16] (narrow) %v638_v12, 8 }
 0x215   :  { %v1620_v13 = vpop.f32.mrb[20].mxu1 }
 0x216   :  { %v651_v14 = vpop.f32.mrb[21].mxu1 }
 0x217   :  { %717 = vxpose.xlu0.b32.cont [3/16] (narrow) %v1616_v9, 8  ;;  %v1621_v15 = vpop.f32.mrb[22].mxu1 }
 0x218   :  { %v654_v16 = vpop.f32.mrb[23].mxu1 }
 0x21b   :  { %718 = vxpose.xlu0.b32.cont [4/16] (narrow) %v1617_v11, 8 }
 0x21d   :  { %v1624_v17 = vpop.f32.mrb[24].mxu1 }
 0x21e   :  { %v667_v18 = vpop.f32.mrb[25].mxu1 }
 0x21f   :  { %719 = vxpose.xlu0.b32.cont [5/16] (narrow) %v651_v14, 8  ;;  %v1625_v19 = vpop.f32.mrb[26].mxu1 }
 0x220   :  { %v670_v20 = vpop.f32.mrb[27].mxu1 }
 0x223   :  { %720 = vxpose.xlu0.b32.cont [6/16] (narrow) %v654_v16, 8 }
 0x225   :  { %v1628_v21 = vpop.f32.mrb[28].mxu1 }
 0x226   :  { %v683_v22 = vpop.f32.mrb[29].mxu1 }
 0x227   :  { %721 = vxpose.xlu0.b32.cont [7/16] (narrow) %v1620_v13, 8  ;;  %v1629_v23 = vpop.f32.mrb[30].mxu1 }
 0x228   :  { %v686_v24 = vpop.f32.mrb[31].mxu1 }
 0x22b   :  { %722 = vxpose.xlu0.b32.cont [8/16] (narrow) %v1621_v15, 8 }
 0x22d   :  { %v1680_v25 = vpop.f32.mrb[32].mxu1 }
 0x22e   :  { %v1090_v26 = vpop.f32.mrb[33].mxu1 }
 0x22f   :  { %723 = vxpose.xlu0.b32.cont [9/16] (narrow) %v667_v18, 8  ;;  %1170 = vxpose.xlu1.b32.start [1/16] (narrow) %v1090_v26, 8  ;;  %v1681_v27 = vpop.f32.mrb[34].mxu1 }
 0x230   :  { %v1093_v28 = vpop.f32.mrb[35].mxu1 }
 0x231   :  { %1776 = shalt.err (!%p1773_p4)
}
 0x232   :  { %s1777_s17 = scalar_lea.hbm %s2232_s4, 2048 }
 0x233   :  { %p1778_p5 = scmp.ne.s32.totalorder %s2232_s4, %s1777_s17  ;;  %p1781_p6 = scmp.lt.u32.totalorder %s1777_s17, %s2232_s4 }
 0x235   :  { %p1783_p7 = pnand %p1781_p6, %p1778_p5 }
 0x237   :  { %1786 = shalt.err (!%p1783_p7)
}
 0x238   :  { %s1815_s21 = smov 64   ;;  %s1816_s22 = smov 4   ;;  %724 = vxpose.xlu0.b32.cont [10/16] (narrow) %v670_v20, 8  ;;  %1171 = vxpose.xlu1.b32.cont [2/16] (narrow) %v1093_v28, 8  ;;  %v1684_v29 = vpop.f32.mrb[36].mxu1 }
 0x239   :  { %1215 = dma.vmem_to_hbm [thread:$0]  %s1210_s13, 2048, %s2232_s4, [#allocation3], %s1815_s21, %s1815_s21, %s1816_s22   ;;  %v1106_v30 = vpop.f32.mrb[37].mxu1 }
 0x23a   :  { %v1685_v31 = vpop.f32.mrb[38].mxu1  ;;  %s1817_s4 = smov [#allocation4]  }
 0x23b   :  { %v1109_v32 = vpop.f32.mrb[39].mxu1  ;;  %s1223_s24 = sshll.u32 %s1817_s4, 4  ;;  %s1224_s24 = int_to_ptr.vmem [resolvable:$true] %s1223_s24 }
 0x23c   :  { %725 = vxpose.xlu0.b32.cont [11/16] (narrow) %v1624_v17, 8  ;;  %1172 = vxpose.xlu1.b32.cont [3/16] (narrow) %v1680_v25, 8  ;;  %s1787_s25 = scalar_lea.vmem %s1224_s24, 32  ;;  %p1792_p9 = scmp.lt.s32.totalorder %s1224_s24, %s1224_s24 }
 0x23d   :  { %v1688_v33 = vpop.f32.mrb[40].mxu1  ;;  %p1788_p8 = scmp.ne.s32.totalorder %s1224_s24, %s1787_s25  ;;  %p1793_p10 = scmp.lt.s32.totalorder %s1787_s25, %s1787_s25 }
 0x23e   :  { %v1122_v34 = vpop.f32.mrb[41].mxu1 }
 0x23f   :  { %v1689_v35 = vpop.f32.mrb[42].mxu1  ;;  %p1794_p11 = por %p1793_p10, %p1792_p9 }
 0x240   :  { %726 = vxpose.xlu0.b32.cont [12/16] (narrow) %v1625_v19, 8  ;;  %1173 = vxpose.xlu1.b32.cont [4/16] (narrow) %v1681_v27, 8  ;;  %v1125_v36 = vpop.f32.mrb[43].mxu1 }
 0x241   :  { %p1795_p12 = pnand %p1794_p11, %p1788_p8 }
 0x244   :  { %727 = vxpose.xlu0.b32.cont [13/16] (narrow) %v683_v22, 8  ;;  %1174 = vxpose.xlu1.b32.cont [5/16] (narrow) %v1106_v30, 8 }
 0x245   :  { %v1692_v37 = vpop.f32.mrb[44].mxu1 }
 0x246   :  { %v1138_v38 = vpop.f32.mrb[45].mxu1 }
 0x247   :  { %v1693_v39 = vpop.f32.mrb[46].mxu1 }
 0x248   :  { %728 = vxpose.xlu0.b32.cont [14/16] (narrow) %v686_v24, 8  ;;  %1175 = vxpose.xlu1.b32.cont [6/16] (narrow) %v1109_v32, 8  ;;  %v1141_v40 = vpop.f32.mrb[47].mxu1 }
 0x24c   :  { %729 = vxpose.xlu0.b32.cont [15/16] (narrow) %v1628_v21, 8  ;;  %1176 = vxpose.xlu1.b32.cont [7/16] (narrow) %v1684_v29, 8 }
 0x250   :  { %730 = vxpose.xlu0.b32.end [16/16] (narrow) %v1629_v23, 8  ;;  %1177 = vxpose.xlu1.b32.cont [8/16] (narrow) %v1685_v31, 8 }
 0x254   :  { %1178 = vxpose.xlu1.b32.cont [9/16] (narrow) %v1122_v34, 8 }
 0x258   :  { %1179 = vxpose.xlu1.b32.cont [10/16] (narrow) %v1125_v36, 8 }
 0x25c   :  { %1180 = vxpose.xlu1.b32.cont [11/16] (narrow) %v1688_v33, 8 }
 0x260   :  { %1181 = vxpose.xlu1.b32.cont [12/16] (narrow) %v1689_v35, 8 }
 0x264   :  { %1182 = vxpose.xlu1.b32.cont [13/16] (narrow) %v1138_v38, 8 }
 0x268   :  { %1183 = vxpose.xlu1.b32.cont [14/16] (narrow) %v1141_v40, 8 }
 0x26c   :  { %1184 = vxpose.xlu1.b32.cont [15/16] (narrow) %v1692_v37, 8 }
 0x270   :  { %1185 = vxpose.xlu1.b32.end [16/16] (narrow) %v1693_v39, 8 }
 0x294   :  { %v731_v41 = vpop.trf.xlu0 }
 0x295   :  { %747 = vst [vmem:[#allocation4] sm:$0x1] %v731_v41 }
 0x2b4   :  { %v1186_v42 = vpop.trf.xlu1 }
 0x2b5   :  { %1203 = vst [vmem:[#allocation4 + $0x1] sm:$0x1] %v1186_v42 }
 0x2b6   :  { %1798 = shalt.err (!%p1795_p12)
}
 0x2b7   :  { %s1799_s2 = scalar_lea.hbm %s2234_s6, 32 }
 0x2b8   :  { %p1800_p13 = scmp.ne.s32.totalorder %s2234_s6, %s1799_s2  ;;  %p1803_p0 = scmp.lt.u32.totalorder %s1799_s2, %s2234_s6 }
 0x2ba   :  { %p1805_p1 = pnand %p1803_p0, %p1800_p13 }
 0x2bc   :  { %1808 = shalt.err (!%p1805_p1)
}
 0x2bd   :  { %s1818_s7 = smov 16   ;;  %s1819_s8 = smov 1  }
 0x2be   :  { %1229 = dma.vmem_to_hbm [thread:$0]  %s1224_s24, 32, %s2234_s6, [#allocation5], %s1818_s7, %s1818_s7, %s1819_s8  }
 0x2bf   :  { %1809 = dma.done.wait [#allocation3], 2048  }
 0x2c0   :  { %1810 = vsyncadd [#allocation3], 4294965248 }
 0x2c1   :  { %1811 = dma.done.wait [#allocation5], 32  }
 0x2c2   :  { %1812 = vsyncadd [#allocation5], 4294967264 }
 0x2c3   :  { %1238 = vsyncpa [#allocation3], 1 }
 0x2c4   :  { %1239 = vsyncpa [#allocation5], 1 }

</bundles_post_ra>
